<compile_context>
chip_gen: v6e
topology: v6e:2x2x1
jax: 0.10.0
libtpu: 0.0.40
codegen_flags: <defaults>
</compile_context>

<pallas_src>
import functools

import jax
import jax.numpy as jnp
from jax import lax
from jax.experimental import pallas as pl
from jax.experimental.pallas import tpu as pltpu

BLOCK_SIZE = 64      # max sequence length (causal mask size)
N_EMBD = 128         # embedding dim C
HEAD_SIZE = 32       # head size H
NEG_INF = -1e30      # large finite value for masking (safer than -inf)


def head_kernel(x_ref, w_ref, o_ref, *, B, T, scale):
    # x_ref: (B*T, C)   w_ref: (C, 3H) fused [key | query | value]   o_ref: (B*T, H)
    x = x_ref[...].astype(jnp.bfloat16)            # (B*T, C)
    w = w_ref[...].astype(jnp.bfloat16)            # (C, 3H)

    # Single fused QKV projection on the MXU, f32 accumulation.
    qkv = jnp.dot(x, w, preferred_element_type=jnp.float32)          # (B*T, 3H) f32
    H = qkv.shape[-1] // 3
    qkv = qkv.reshape(B, T, 3 * H)                                   # (B, T, 3H)
    k = qkv[:, :, 0 * H:1 * H].astype(jnp.bfloat16)                  # (B, T, H)
    q = qkv[:, :, 1 * H:2 * H].astype(jnp.bfloat16)                  # (B, T, H)
    v = qkv[:, :, 2 * H:3 * H].astype(jnp.bfloat16)                  # (B, T, H)

    # Attention scores: batched contraction on the head dim (no transpose),
    # scaled by C**-0.5 (nanoGPT Head uses C, not head_size).
    wei = jnp.einsum('bqd,bkd->bqk', q, k,
                     preferred_element_type=jnp.float32) * scale     # (B, T, T) f32

    # Causal mask: positions j > i get a very large negative value.
    row = lax.broadcasted_iota(jnp.int32, (B, T, T), 1)
    col = lax.broadcasted_iota(jnp.int32, (B, T, T), 2)
    wei = jnp.where(col <= row, wei, NEG_INF)

    # Numerically stable softmax over the key axis.
    wei = wei - jnp.max(wei, axis=-1, keepdims=True)
    wei = jnp.exp(wei)
    wei = wei * pl.reciprocal(jnp.sum(wei, axis=-1, keepdims=True), approx=True)

    # dropout (eval mode) -> identity.

    # Weighted aggregation of values (bf16 operands, f32 accumulation).
    out = jnp.einsum('bqk,bkd->bqd', wei.astype(jnp.bfloat16), v,
                     preferred_element_type=jnp.float32)             # (B, T, H)
    o_ref[...] = out.reshape(B * T, H).astype(o_ref.dtype)


def head_forward(x, w_key, w_query, w_value):
    """x: (B, T, C) float32; weights: (C, H) float32. Returns (B, T, H)."""
    B, T, C = x.shape
    H = w_key.shape[1]
    scale = C ** -0.5                                   # matches PyTorch module

    # Fuse the three projection weights -> one lane-wider MXU matmul.
    w_qkv = jnp.concatenate([w_key, w_query, w_value], axis=1)       # (C, 3H)
    x2d = x.reshape(B * T, C)                                        # fold batch

    flops = 2 * (B * T) * C * (3 * H) + 2 * 2 * B * T * T * H
    bytes_accessed = 4 * (B * T * C + C * 3 * H + B * T * H)

    kernel = functools.partial(head_kernel, B=B, T=T, scale=scale)
    out2d = pl.pallas_call(
        kernel,
        out_shape=jax.ShapeDtypeStruct((B * T, H), x.dtype),
        grid=(1,),
        in_specs=[
            pl.BlockSpec((B * T, C), lambda i: (0, 0)),
            pl.BlockSpec((C, 3 * H), lambda i: (0, 0)),
        ],
        out_specs=pl.BlockSpec((B * T, H), lambda i: (0, 0)),
        cost_estimate=pl.CostEstimate(
            flops=flops,
            transcendentals=B * T * T,
            bytes_accessed=bytes_accessed,
        ),
        compiler_params=pltpu.CompilerParams(
            dimension_semantics=("arbitrary",),
        ),
    )(x2d, w_qkv)
    return out2d.reshape(B, T, H)


def reference_head(x, w_key, w_query, w_value):
    """Pure-JAX f32 reference matching the PyTorch forward."""
    B, T, C = x.shape
    k = x @ w_key
    q = x @ w_query
    v = x @ w_value
    wei = (q @ jnp.swapaxes(k, -2, -1)) * (C ** -0.5)
    tril = jnp.tril(jnp.ones((T, T), dtype=bool))
    wei = jnp.where(tril, wei, -jnp.inf)
    wei = jax.nn.softmax(wei, axis=-1)
    return wei @ v


if __name__ == "__main__":
    key = jax.random.PRNGKey(0)
    kx, kk, kq, kv = jax.random.split(key, 4)

    B, T, C, H = 2, BLOCK_SIZE, N_EMBD, HEAD_SIZE

    x = jax.random.normal(kx, (B, T, C), dtype=jnp.float32)
    # deterministic init mimicking nn.Linear(n_embd, head_size, bias=False)
    bound = 1.0 / (C ** 0.5)
    w_key = jax.random.uniform(kk, (C, H), jnp.float32, -bound, bound)
    w_query = jax.random.uniform(kq, (C, H), jnp.float32, -bound, bound)
    w_value = jax.random.uniform(kv, (C, H), jnp.float32, -bound, bound)

    out = head_forward(x, w_key, w_query, w_value)
    out = jax.block_until_ready(out)

    ref = reference_head(x, w_key, w_query, w_value)
    assert out.shape == (B, T, H)
    # bf16 MXU operands with f32 accumulation -> slightly looser tolerance.
    assert jnp.allclose(out, ref, atol=2e-2, rtol=2e-2), "mismatch vs reference"

    print("KERNEL_OK")
</pallas_src>

<mosaic_0001>
module attributes {stable_mosaic.version = 11 : i64} {
  func.func @head_kernel(%arg0: i32, %arg1: memref<128x128xf32, #tpu.memory_space<vmem>>, %arg2: memref<128x96xf32, #tpu.memory_space<vmem>>, %arg3: memref<128x32xf32, #tpu.memory_space<vmem>>) attributes {dimension_semantics = [#tpu.dimension_semantics<arbitrary>], iteration_bounds = array<i64: 1>, scalar_prefetch = 0 : i64, scratch_operands = 0 : i64, tpu.core_type = #tpu.core_type<tc>, window_params = [{pipeline_mode = #tpu.pipeline_mode<synchronous>, transform_indices = @transform_0, window_bounds = array<i64: 128, 128>}, {pipeline_mode = #tpu.pipeline_mode<synchronous>, transform_indices = @transform_1, window_bounds = array<i64: 128, 96>}, {pipeline_mode = #tpu.pipeline_mode<synchronous>, transform_indices = @transform_2, window_bounds = array<i64: 128, 32>}]} {
    %c0 = arith.constant 0 : index
    %c0_0 = arith.constant 0 : index
    %0 = vector.load %arg1[%c0, %c0_0] : memref<128x128xf32, #tpu.memory_space<vmem>>, vector<128x128xf32>
    %1 = arith.truncf %0 : vector<128x128xf32> to vector<128x128xbf16>
    %c0_1 = arith.constant 0 : index
    %c0_2 = arith.constant 0 : index
    %2 = vector.load %arg2[%c0_1, %c0_2] : memref<128x96xf32, #tpu.memory_space<vmem>>, vector<128x96xf32>
    %3 = arith.truncf %2 : vector<128x96xf32> to vector<128x96xbf16>
    %cst = arith.constant dense<0.000000e+00> : vector<128x96xf32>
    %4 = tpu.matmul %1, %3, %cst {dimension_numbers = #tpu.dot_dimension_numbers<[1], [0], [0], [1], [0, 0, 1, 1], [], []>} : vector<128x128xbf16>, vector<128x96xbf16>, vector<128x96xf32> -> vector<128x96xf32>
    %5 = vector.shape_cast %4 : vector<128x96xf32> to vector<2x64x96xf32>
    %6 = vector.extract_strided_slice %5 {offsets = [0, 0, 0], sizes = [2, 64, 32], strides = [1, 1, 1]} : vector<2x64x96xf32> to vector<2x64x32xf32>
    %7 = arith.truncf %6 : vector<2x64x32xf32> to vector<2x64x32xbf16>
    %8 = vector.extract_strided_slice %5 {offsets = [0, 0, 32], sizes = [2, 64, 32], strides = [1, 1, 1]} : vector<2x64x96xf32> to vector<2x64x32xf32>
    %9 = arith.truncf %8 : vector<2x64x32xf32> to vector<2x64x32xbf16>
    %10 = vector.extract_strided_slice %5 {offsets = [0, 0, 64], sizes = [2, 64, 32], strides = [1, 1, 1]} : vector<2x64x96xf32> to vector<2x64x32xf32>
    %11 = arith.truncf %10 : vector<2x64x32xf32> to vector<2x64x32xbf16>
    "tpu.trace_start"() <{level = 10 : i32, message = "bqd,bkd->bqk"}> : () -> ()
    %cst_3 = arith.constant dense<0.000000e+00> : vector<2x64x64xf32>
    %12 = tpu.matmul %9, %7, %cst_3 {dimension_numbers = #tpu.dot_dimension_numbers<[2], [2], [1], [1], [0, 0, 0, 1, 1, 1], [0], [0]>} : vector<2x64x32xbf16>, vector<2x64x32xbf16>, vector<2x64x64xf32> -> vector<2x64x64xf32>
    "tpu.trace_stop"() : () -> ()
    %cst_4 = arith.constant 0.0883883461 : f32
    %13 = vector.broadcast %cst_4 : f32 to vector<2x64x64xf32>
    %14 = arith.mulf %12, %13 : vector<2x64x64xf32>
    %15 = tpu.iota {dimensions = array<i32: 1>} : vector<2x64x64xi32>
    %16 = tpu.iota {dimensions = array<i32: 2>} : vector<2x64x64xi32>
    %17 = arith.cmpi sle, %16, %15 : vector<2x64x64xi32>
    %cst_5 = arith.constant -1.000000e+30 : f32
    %18 = vector.broadcast %cst_5 : f32 to vector<2x64x64xf32>
    %19 = arith.select %17, %14, %18 : vector<2x64x64xi1>, vector<2x64x64xf32>
    %cst_6 = arith.constant dense<0xFF800000> : vector<2x64xf32>
    %20 = vector.multi_reduction <maximumf>, %19, %cst_6 [2] : vector<2x64x64xf32> to vector<2x64xf32>
    %21 = vector.shape_cast %20 : vector<2x64xf32> to vector<2x64x1xf32>
    %22 = vector.broadcast %21 : vector<2x64x1xf32> to vector<2x64x64xf32>
    %23 = arith.subf %19, %22 : vector<2x64x64xf32>
    %24 = math.exp %23 : vector<2x64x64xf32>
    %cst_7 = arith.constant dense<0.000000e+00> : vector<2x64xf32>
    %25 = vector.multi_reduction <add>, %24, %cst_7 [2] : vector<2x64x64xf32> to vector<2x64xf32>
    %26 = vector.shape_cast %25 : vector<2x64xf32> to vector<2x64x1xf32>
    %27 = tpu.reciprocal %26 {approx = true} : vector<2x64x1xf32> -> vector<2x64x1xf32>
    %28 = vector.broadcast %27 : vector<2x64x1xf32> to vector<2x64x64xf32>
    %29 = arith.mulf %24, %28 : vector<2x64x64xf32>
    %30 = arith.truncf %29 : vector<2x64x64xf32> to vector<2x64x64xbf16>
    "tpu.trace_start"() <{level = 10 : i32, message = "bqk,bkd->bqd"}> : () -> ()
    %cst_8 = arith.constant dense<0.000000e+00> : vector<2x64x32xf32>
    %31 = tpu.matmul %30, %11, %cst_8 {dimension_numbers = #tpu.dot_dimension_numbers<[2], [1], [1], [2], [0, 0, 0, 1, 1, 2], [0], [0]>} : vector<2x64x64xbf16>, vector<2x64x32xbf16>, vector<2x64x32xf32> -> vector<2x64x32xf32>
    "tpu.trace_stop"() : () -> ()
    %32 = vector.shape_cast %31 : vector<2x64x32xf32> to vector<128x32xf32>
    %c0_9 = arith.constant 0 : index
    %c0_10 = arith.constant 0 : index
    %33 = vector.load %arg3[%c0_9, %c0_10] : memref<128x32xf32, #tpu.memory_space<vmem>>, vector<128x32xf32>
    tpu.vector_store %arg3[%c0_9, %c0_10], %32 {strides = array<i32>} : memref<128x32xf32, #tpu.memory_space<vmem>>, vector<128x32xf32>,
    return
  }
  func.func @transform_0(%arg0: i32) -> (i32, i32) {
    %c0_i32 = arith.constant 0 : i32
    %c0_i32_0 = arith.constant 0 : i32
    %c0_i32_1 = arith.constant 0 : i32
    return %c0_i32, %c0_i32_0 : i32, i32
  }
  func.func @transform_1(%arg0: i32) -> (i32, i32) {
    %c0_i32 = arith.constant 0 : i32
    %c0_i32_0 = arith.constant 0 : i32
    %c0_i32_1 = arith.constant 0 : i32
    return %c0_i32, %c0_i32_0 : i32, i32
  }
  func.func @transform_2(%arg0: i32) -> (i32, i32) {
    %c0_i32 = arith.constant 0 : i32
    %c0_i32_0 = arith.constant 0 : i32
    %c0_i32_1 = arith.constant 0 : i32
    return %c0_i32, %c0_i32_0 : i32, i32
  }
}

</mosaic_0001>

<bundles_post_ra>
// kernel: tpu_custom_call.1
= control target key start
LH: loop header
LB: loop body
LE: loop exit
PB: predicated region body
PF: predicated region fallthrough
CT: control target
= control target key end

     0   :  { %s1036_s16 = smov 96   ;;  %vm177_vm0 = vcmask 261120   ;;  %vm419_vm2 = vcmask 523264   ;;  %s1531_s1 = inlined_call_operand.vmem [shape: f32[128,96], index: 1, kind: input, shape index: {}]   ;;  %s1532_s0 = inlined_call_operand.vmem [shape: f32[128,128], index: 0, kind: input, shape index: {}]   ;;  %s1533_s2 = inlined_call_operand.vmem [shape: f32[128,32], index: 2, kind: output, shape index: {}]  }
   0x1   :  { %v50_v0 = vld [vmem:[%s1531_s1 + $0x70] sm:$0xff]  ;;  %v51_v1 = vld [vmem:[%s1531_s1 + $0x78] sm:$0xff]  ;;  %v48_v2 = vld [vmem:[%s1531_s1 + $0x60] sm:$0xff] }
   0x2   :  { %v59_v3 = vpack.c.bf16 %v51_v1, %v50_v0  ;;  %v49_v4 = vld [vmem:[%s1531_s1 + $0x68] sm:$0xff]  ;;  %v46_v6 = vld [vmem:[%s1531_s1 + $0x50] sm:$0xff]  ;;  %v47_v7 = vld [vmem:[%s1531_s1 + $0x58] sm:$0xff] }
   0x3   :  { %v58_v5 = vpack.c.bf16 %v49_v4, %v48_v2  ;;  %v57_v8 = vpack.c.bf16 %v47_v7, %v46_v6  ;;  %v12_v9 = vld [vmem:[%s1532_s0] sm:$0xff]  ;;  %v13_v10 = vld [vmem:[%s1532_s0 + $0x8] sm:$0xff]  ;;  %v42_v15 = vld [vmem:[%s1531_s1 + $0x30] sm:$0xff] }
   0x4   :  { %866 = vmatprep.subr.bf16.mxu0 %v59_v3  ;;  %v44_v11 = vld [vmem:[%s1531_s1 + $0x40] sm:$0xff]  ;;  %v45_v12 = vld [vmem:[%s1531_s1 + $0x48] sm:$0xff]  ;;  %v28_v13 = vpack.c.bf16 %v13_v10, %v12_v9  ;;  %v43_v16 = vld [vmem:[%s1531_s1 + $0x38] sm:$0xff] }
   0x5   :  { %867 = vmatpush3.bf16.msra.mxu0 %v59_v3  ;;  %v56_v14 = vpack.c.bf16 %v45_v12, %v44_v11  ;;  %v55_v17 = vpack.c.bf16 %v43_v16, %v42_v15  ;;  %v40_v18 = vld [vmem:[%s1531_s1 + $0x20] sm:$0xff]  ;;  %v41_v19 = vld [vmem:[%s1531_s1 + $0x28] sm:$0xff]  ;;  %v38_v21 = vld [vmem:[%s1531_s1 + $0x10] sm:$0xff] }
   0x6   :  { %868 = vmatprep.subr.bf16.mxu0 %v58_v5  ;;  %882 = vmatprep.mubr.bf16.mxu0 %v28_v13  ;;  %v54_v20 = vpack.c.bf16 %v41_v19, %v40_v18  ;;  %v39_v22 = vld [vmem:[%s1531_s1 + $0x18] sm:$0xff]  ;;  %v36_v24 = vld [vmem:[%s1531_s1] sm:$0xff]  ;;  %v37_v25 = vld [vmem:[%s1531_s1 + $0x8] sm:$0xff] }
   0x7   :  { %v53_v23 = vpack.c.bf16 %v39_v22, %v38_v21  ;;  %v52_v26 = vpack.c.bf16 %v37_v25, %v36_v24  ;;  %v14_v27 = vld [vmem:[%s1532_s0 + $0x10] sm:$0xff]  ;;  %v15_v28 = vld [vmem:[%s1532_s0 + $0x18] sm:$0xff]  ;;  %v16_v29 = vld [vmem:[%s1532_s0 + $0x20] sm:$0xff] }
   0x8   :  { %v17_v30 = vld [vmem:[%s1532_s0 + $0x28] sm:$0xff]  ;;  %v29_v31 = vpack.c.bf16 %v15_v28, %v14_v27  ;;  %v18_v33 = vld [vmem:[%s1532_s0 + $0x30] sm:$0xff]  ;;  %v19_v34 = vld [vmem:[%s1532_s0 + $0x38] sm:$0xff] }
   0x9   :  { %869 = vmatpush3.bf16.msra.mxu0 %v58_v5  ;;  %v30_v32 = vpack.c.bf16 %v17_v30, %v16_v29  ;;  %v20_v35 = vld [vmem:[%s1532_s0 + $0x40] sm:$0xff]  ;;  %v21_v36 = vld [vmem:[%s1532_s0 + $0x48] sm:$0xff]  ;;  %v31_v37 = vpack.c.bf16 %v19_v34, %v18_v33  ;;  %v22_v39 = vld [vmem:[%s1532_s0 + $0x50] sm:$0xff] }
   0xa   :  { %870 = vmatprep.subr.bf16.mxu0 %v57_v8  ;;  %v32_v38 = vpack.c.bf16 %v21_v36, %v20_v35  ;;  %v23_v40 = vld [vmem:[%s1532_s0 + $0x58] sm:$0xff]  ;;  %v24_v41 = vld [vmem:[%s1532_s0 + $0x60] sm:$0xff]  ;;  %v25_v42 = vld [vmem:[%s1532_s0 + $0x68] sm:$0xff] }
   0xb   :  { %v33_v43 = vpack.c.bf16 %v23_v40, %v22_v39  ;;  %v34_v44 = vpack.c.bf16 %v25_v42, %v24_v41  ;;  %v26_v45 = vld [vmem:[%s1532_s0 + $0x70] sm:$0xff]  ;;  %v27_v46 = vld [vmem:[%s1532_s0 + $0x78] sm:$0xff]  ;;  %s1037_s0 = smov 64  }
   0xc   :  { %v35_v47 = vpack.c.bf16 %v27_v46, %v26_v45 }
   0xd   :  { %871 = vmatpush3.bf16.msra.mxu0 %v57_v8 }
   0xe   :  { %872 = vmatprep.subr.bf16.mxu0 %v56_v14 }
  0x11   :  { %873 = vmatpush3.bf16.msra.mxu0 %v56_v14 }
  0x12   :  { %874 = vmatprep.subr.bf16.mxu0 %v55_v17 }
  0x15   :  { %875 = vmatpush3.bf16.msra.mxu0 %v55_v17 }
  0x16   :  { %876 = vmatprep.subr.bf16.mxu0 %v54_v20 }
  0x19   :  { %877 = vmatpush3.bf16.msra.mxu0 %v54_v20 }
  0x1a   :  { %878 = vmatprep.subr.bf16.mxu0 %v53_v23 }
  0x1d   :  { %879 = vmatpush3.bf16.msra.mxu0 %v53_v23 }
  0x1e   :  { %880 = vmatprep.subr.bf16.mxu0 %v52_v26 }
  0x21   :  { %881 = vmatpush3.bf16.msra.mxu0 %v52_v26  ;;  %v384_v26 = vlaneseq }
  0x23   :  { %v1213_v27 = vshrl.u32 %v384_v26, 7  ;;  %v1216_v29 = vand.u32 127, %v384_v26 }
  0x24   :  { %883 = vmatmul.mubr.bf16.vlgmr.msra.gmra.mxu0 %v29_v31 }
  0x25   :  { %886 = vmatprep.mubr.bf16.mxu0 %v30_v32  ;;  %v387_v28 = vadd.s32 16, %v1213_v27  ;;  %vm395_vm3 = vcmp.le.s32.totalorder %v1216_v29, %v1213_v27  ;;  %v1222_v33 = vadd.s32 8, %v1213_v27  ;;  %v388_v34 = vadd.s32 24, %v1213_v27 }
  0x26   :  { %v1232_v39 = vadd.s32 48, %v1213_v27  ;;  %v1247_v46 = vadd.s32 56, %v1213_v27 }
  0x27   :  { %vm397_vm1 = vcmp.le.s32.totalorder %v1216_v29, %v387_v28  ;;  %vm396_vm4 = vcmp.le.s32.totalorder %v1216_v29, %v1222_v33  ;;  %vm398_vm5 = vcmp.le.s32.totalorder %v1216_v29, %v388_v34 }
  0x28   :  { %vm401_vm6 = vcmp.le.s32.totalorder %v1216_v29, %v1232_v39  ;;  %vm402_vm7 = vcmp.le.s32.totalorder %v1216_v29, %v1247_v46 }
  0x2c   :  { %887 = vmatmul.mubr.bf16.gmra.mxu0 %v31_v37 }
  0x2d   :  { %890 = vmatprep.mubr.bf16.mxu0 %v32_v38 }
  0x34   :  { %891 = vmatmul.mubr.bf16.gmra.mxu0 %v33_v43 }
  0x35   :  { %894 = vmatprep.mubr.bf16.mxu0 %v34_v44 }
  0x3c   :  { %895 = vmatmul.mubr.bf16.gmra.mxu0 %v35_v47  ;;  %v1250_v47 = vadd.s32 32, %v1213_v27 }
  0x3e   :  { %vm399_vm8 = vcmp.le.s32.totalorder %v1216_v29, %v1250_v47 }
  0xe4   :  { %v884_v48 = vpop.f32.mrf.mxu0 }
  0xe6   :  { %v94_v49 = vpop.f32.mrf.mxu0 }
  0xe8   :  { %v885_v50 = vpop.f32.mrf.mxu0 }
  0xe9   :  { %v1153_v55 = vpack.c.bf16 %v885_v50, %v884_v48 }
  0xea   :  { %v97_v51 = vpop.f32.mrf.mxu0 }
  0xeb   :  { %v1149_v52 = vpack.c.bf16 %v97_v51, %v94_v49  ;;  %v194_v10 = vsel %vm177_vm0, %v1153_v55, 0 }
  0xec   :  { %v888_v53 = vpop.f32.mrf.mxu0 }
  0xed   :  { %169 = vrot.lane.b32.xlu0 %v1149_v52, %s1036_s16  ;;  %v191_v13 = vsel %vm177_vm0, %v1149_v52, 0 }
  0xee   :  { %v110_v54 = vpop.f32.mrf.mxu0 }
  0xf0   :  { %v889_v56 = vpop.f32.mrf.mxu0 }
  0xf1   :  { %v160_v57 = vpack.c.bf16 %v889_v56, %v888_v53  ;;  %171 = vrot.lane.b32.xlu0 %v1153_v55, %s1036_s16 }
  0xf2   :  { %v113_v58 = vpop.f32.mrf.mxu0 }
  0xf3   :  { %v159_v59 = vpack.c.bf16 %v113_v58, %v110_v54  ;;  %962 = vmatprep.subr.msk.bf16.mxu1 %vm177_vm0, %v160_v57  ;;  %v200_v60 = vsel %vm177_vm0, %v160_v57, 0  ;;  %v390_v54 = vadd.s32 40, %v1213_v27 }
  0xf4   :  { %v892_v61 = vpop.f32.mrf.mxu0  ;;  %899 = vmatpush3.bf16.xpose.msra.mxu1 %v200_v60 }
  0xf5   :  { %173 = vrot.lane.b32.xlu1 %v159_v59, %s1036_s16  ;;  %963 = vmatprep.subr.msk.bf16.mxu1 %vm177_vm0, %v159_v59  ;;  %v197_v3 = vsel %vm177_vm0, %v159_v59, 0  ;;  %vm400_vm9 = vcmp.le.s32.totalorder %v1216_v29, %v390_v54 }
  0xf6   :  { %v126_v62 = vpop.f32.mrf.mxu0 }
  0xf8   :  { %v893_v63 = vpop.f32.mrf.mxu0 }
  0xf9   :  { %175 = vrot.lane.b32.xlu1 %v160_v57, %s1036_s16  ;;  %v1162_v0 = vpack.c.bf16 %v893_v63, %v892_v61 }
  0xfa   :  { %v129_v1 = vpop.f32.mrf.mxu0 }
  0xfb   :  { %v1164_v2 = vpack.c.bf16 %v129_v1, %v126_v62  ;;  %v295_v14 = vsel %vm177_vm0, %v1162_v0, 0 }
  0xfc   :  { %v896_v4 = vpop.f32.mrf.mxu0  ;;  %901 = vmatpush3.bf16.xpose.msra.mxu1 %v197_v3 }
  0xfd   :  { %964 = vmatprep.subr.msk.bf16.mxu1 %vm177_vm0, %v1153_v55  ;;  %271 = vrot.lane.b32.xlu0 %v1164_v2, %s1036_s16  ;;  %v292_v15 = vsel %vm177_vm0, %v1164_v2, 0 }
  0xfe   :  { %273 = vrot.lane.b32.xlu1 %v1162_v0, %s1036_s16  ;;  %v142_v5 = vpop.f32.mrf.mxu0 }
 0x100   :  { %v897_v6 = vpop.f32.mrf.mxu0 }
 0x101   :  { %v1173_v7 = vpack.c.bf16 %v897_v6, %v896_v4 }
 0x102   :  { %v145_v8 = vpop.f32.mrf.mxu0 }
 0x103   :  { %v1175_v9 = vpack.c.bf16 %v145_v8, %v142_v5  ;;  %277 = vrot.lane.b32.xlu1 %v1173_v7, %s1036_s16  ;;  %966 = vmatprep.subr.msk.bf16.mxu0 %vm177_vm0, %v1173_v7  ;;  %v301_v11 = vsel %vm177_vm0, %v1173_v7, 0 }
 0x104   :  { %903 = vmatpush3.bf16.xpose.msra.mxu1 %v194_v10  ;;  %915 = vmatpush3.bf16.xpose.msra.mxu0 %v301_v11 }
 0x105   :  { %965 = vmatprep.subr.msk.bf16.mxu1 %vm177_vm0, %v1149_v52  ;;  %275 = vrot.lane.b32.xlu0 %v1175_v9, %s1036_s16  ;;  %v298_v12 = vsel %vm177_vm0, %v1175_v9, 0 }
 0x106   :  { %967 = vmatprep.subr.msk.bf16.mxu0 %vm177_vm0, %v1175_v9 }
 0x107   :  { %610 = vrot.lane.b32.xlu1 %v160_v57, %s1037_s0 }
 0x10b   :  { %608 = vrot.lane.b32.xlu1 %v159_v59, %s1037_s0 }
 0x10c   :  { %905 = vmatpush3.bf16.xpose.msra.mxu1 %v191_v13  ;;  %917 = vmatpush3.bf16.xpose.msra.mxu0 %v298_v12 }
 0x10d   :  { %968 = vmatprep.subr.msk.bf16.mxu0 %vm177_vm0, %v1162_v0 }
 0x114   :  { %919 = vmatpush3.bf16.xpose.msra.mxu0 %v295_v14 }
 0x115   :  { %969 = vmatprep.subr.msk.bf16.mxu0 %vm177_vm0, %v1164_v2 }
 0x11c   :  { %921 = vmatpush3.bf16.xpose.msra.mxu0 %v292_v15 }
 0x15f   :  { %v170_v16 = vpop.permute.xlu0 %169 }
 0x160   :  { %906 = vmatprep.mubr.msk.bf16.mxu1 %vm177_vm0, %v170_v16 }
 0x163   :  { %v172_v17 = vpop.permute.xlu0 %171 }
 0x164   :  { %907 = vmatmul.mubr.msk.bf16.vlgmr.msra.gmra.mxu1 %vm177_vm0, %v172_v17 }
 0x167   :  { %v174_v18 = vpop.permute.xlu1 %173 }
 0x168   :  { %910 = vmatprep.mubr.msk.bf16.mxu1 %vm177_vm0, %v174_v18 }
 0x16b   :  { %v176_v19 = vpop.permute.xlu1 %175 }
 0x16c   :  { %911 = vmatmul.mubr.msk.bf16.gmra.mxu1 %vm177_vm0, %v176_v19 }
 0x16f   :  { %v272_v20 = vpop.permute.xlu0 %271 }
 0x170   :  { %v274_v21 = vpop.permute.xlu1 %273  ;;  %922 = vmatprep.mubr.msk.bf16.mxu0 %vm177_vm0, %v272_v20 }
 0x171   :  { %923 = vmatmul.mubr.msk.bf16.vlgmr.msra.gmra.mxu0 %vm177_vm0, %v274_v21 }
 0x175   :  { %v278_v22 = vpop.permute.xlu1 %277 }
 0x177   :  { %v276_v23 = vpop.permute.xlu0 %275 }
 0x178   :  { %926 = vmatprep.mubr.msk.bf16.mxu0 %vm177_vm0, %v276_v23 }
 0x179   :  { %v611_v24 = vpop.permute.xlu1 %610  ;;  %927 = vmatmul.mubr.msk.bf16.gmra.mxu0 %vm177_vm0, %v278_v22 }
 0x17a   :  { %930 = vmatprep.subr.bf16.mxu1 %v611_v24 }
 0x17b   :  { %931 = vmatpush3.bf16.msra.mxu1 %v611_v24 }
 0x17d   :  { %v609_v25 = vpop.permute.xlu1 %608 }
 0x17e   :  { %932 = vmatprep.subr.bf16.mxu1 %v609_v25 }
 0x17f   :  { %933 = vmatpush3.bf16.msra.mxu1 %v609_v25 }
 0x224   :  { %v908_v30 = vpop.f32.mrf.mxu1 }
 0x225   :  { %v370_v31 = vmul.f32 0.088388346, %v908_v30 }
 0x226   :  { %v236_v32 = vpop.f32.mrf.mxu1 }
 0x227   :  { %v368_v35 = vmul.f32 0.088388346, %v236_v32  ;;  %v1227_v36 = vsel %vm397_vm1, %v370_v31, -1e+30 }
 0x228   :  { %v909_v37 = vpop.f32.mrf.mxu1  ;;  %v426_v38 = vsel %vm419_vm2, %v1227_v36, -inf }
 0x229   :  { %v371_v40 = vmul.f32 0.088388346, %v909_v37  ;;  %427 = vmax.xlane.f32.xlu0 %v426_v38  ;;  %v1237_v41 = vsel %vm395_vm3, %v368_v35, -1e+30 }
 0x22a   :  { %v239_v42 = vpop.f32.mrf.mxu1  ;;  %v420_v45 = vsel %vm419_vm2, %v1237_v41, -inf }
 0x22b   :  { %v369_v43 = vmul.f32 0.088388346, %v239_v42  ;;  %v1259_v50 = vsel %vm398_vm5, %v371_v40, -1e+30 }
 0x22c   :  { %v912_v44 = vpop.f32.mrf.mxu1  ;;  %v429_v59 = vsel %vm419_vm2, %v1259_v50, -inf }
 0x22d   :  { %v374_v48 = vmul.f32 0.088388346, %v912_v44  ;;  %421 = vmax.xlane.f32.xlu0 %v420_v45  ;;  %v1255_v49 = vsel %vm396_vm4, %v369_v43, -1e+30 }
 0x22e   :  { %v252_v51 = vpop.f32.mrf.mxu1  ;;  %v423_v53 = vsel %vm419_vm2, %v1255_v49, -inf }
 0x22f   :  { %v372_v56 = vmul.f32 0.088388346, %v252_v51  ;;  %424 = vmax.xlane.f32.xlu1 %v423_v53  ;;  %v1267_v57 = vsel %vm401_vm6, %v374_v48, -1e+30 }
 0x230   :  { %v913_v58 = vpop.f32.mrf.mxu1  ;;  %v438_v1 = vsel %vm419_vm2, %v1267_v57, -inf }
 0x231   :  { %v375_v60 = vmul.f32 0.088388346, %v913_v58  ;;  %430 = vmax.xlane.f32.xlu0 %v429_v59  ;;  %v924_v61 = vpop.f32.mrf.mxu0  ;;  %v1286_v6 = vsel %vm399_vm8, %v372_v56, -1e+30 }
 0x232   :  { %v378_v62 = vmul.f32 0.088388346, %v924_v61  ;;  %v255_v63 = vpop.f32.mrf.mxu1  ;;  %v432_v14 = vsel %vm419_vm2, %v1286_v6, -inf }
 0x233   :  { %v373_v3 = vmul.f32 0.088388346, %v255_v63  ;;  %439 = vmax.xlane.f32.xlu1 %v438_v1  ;;  %v337_v4 = vpop.f32.mrf.mxu0  ;;  %v1281_v5 = vsel %vm402_vm7, %v375_v60, -1e+30 }
 0x234   :  { %v441_v8 = vsel %vm419_vm2, %v1281_v5, -inf  ;;  %v1296_v12 = vsel %vm397_vm1, %v378_v62, -1e+30  ;;  %v376_v15 = vmul.f32 0.088388346, %v337_v4 }
 0x235   :  { %442 = vmax.xlane.f32.xlu0 %v441_v8  ;;  %v925_v10 = vpop.f32.mrf.mxu0  ;;  %v1292_v11 = vsel %vm400_vm9, %v373_v3, -1e+30  ;;  %v450_v18 = vsel %vm419_vm2, %v1296_v12, -inf }
 0x236   :  { %v379_v13 = vmul.f32 0.088388346, %v925_v10  ;;  %v435_v17 = vsel %vm419_vm2, %v1292_v11, -inf  ;;  %v1311_v24 = vsel %vm395_vm3, %v376_v15, -1e+30 }
 0x237   :  { %433 = vmax.xlane.f32.xlu1 %v432_v14  ;;  %v340_v16 = vpop.f32.mrf.mxu0  ;;  %v444_v27 = vsel %vm419_vm2, %v1311_v24, -inf }
 0x238   :  { %v377_v19 = vmul.f32 0.088388346, %v340_v16  ;;  %v1306_v21 = vsel %vm398_vm5, %v379_v13, -1e+30 }
 0x239   :  { %436 = vmax.xlane.f32.xlu0 %v435_v17  ;;  %v928_v20 = vpop.f32.mrf.mxu0  ;;  %v453_v25 = vsel %vm419_vm2, %v1306_v21, -inf }
 0x23a   :  { %v382_v22 = vmul.f32 0.088388346, %v928_v20  ;;  %v1318_v28 = vsel %vm396_vm4, %v377_v19, -1e+30 }
 0x23b   :  { %451 = vmax.xlane.f32.xlu1 %v450_v18  ;;  %v353_v23 = vpop.f32.mrf.mxu0  ;;  %v447_v35 = vsel %vm419_vm2, %v1318_v28, -inf }
 0x23c   :  { %v1323_v30 = vsel %vm401_vm6, %v382_v22, -1e+30  ;;  %v380_v32 = vmul.f32 0.088388346, %v353_v23 }
 0x23d   :  { %454 = vmax.xlane.f32.xlu0 %v453_v25  ;;  %v929_v26 = vpop.f32.mrf.mxu0  ;;  %v462_v33 = vsel %vm419_vm2, %v1323_v30, -inf }
 0x23e   :  { %v383_v31 = vmul.f32 0.088388346, %v929_v26  ;;  %v1339_v39 = vsel %vm399_vm8, %v380_v32, -1e+30 }
 0x23f   :  { %445 = vmax.xlane.f32.xlu1 %v444_v27  ;;  %v356_v34 = vpop.f32.mrf.mxu0  ;;  %v456_v43 = vsel %vm419_vm2, %v1339_v39, -inf }
 0x240   :  { %v381_v37 = vmul.f32 0.088388346, %v356_v34  ;;  %v1334_v38 = vsel %vm402_vm7, %v383_v31, -1e+30 }
 0x241   :  { %448 = vmax.xlane.f32.xlu0 %v447_v35  ;;  %v465_v40 = vsel %vm419_vm2, %v1334_v38, -inf }
 0x242   :  { %v1345_v42 = vsel %vm400_vm9, %v381_v37, -1e+30 }
 0x243   :  { %463 = vmax.xlane.f32.xlu1 %v462_v33  ;;  %v459_v44 = vsel %vm419_vm2, %v1345_v42, -inf }
 0x245   :  { %466 = vmax.xlane.f32.xlu0 %v465_v40 }
 0x247   :  { %457 = vmax.xlane.f32.xlu1 %v456_v43 }
 0x249   :  { %460 = vmax.xlane.f32.xlu0 %v459_v44 }
 0x258   :  { %604 = vrot.lane.b32.xlu1 %v1149_v52, %s1037_s0 }
 0x25f   :  { %606 = vrot.lane.b32.xlu0 %v1153_v55, %s1037_s0 }
 0x2b2   :  { %v428_v45 = vpop.xlane.xlu0 %427 }
 0x2b3   :  { %v470_v46 = vsub.f32 %v1227_v36, %v428_v45 }
 0x2b5   :  { %v488_v29 = vmul.f32 1.442695, %v470_v46 }
 0x2b6   :  { %v422_v47 = vpop.xlane.xlu0 %421 }
 0x2b7   :  { %972 = vpow2.f32 %v488_v29  ;;  %v468_v48 = vsub.f32 %v1237_v41, %v422_v47 }
 0x2b8   :  { %v425_v51 = vpop.xlane.xlu1 %424 }
 0x2b9   :  { %v484_v53 = vmul.f32 1.442695, %v468_v48  ;;  %v469_v54 = vsub.f32 %v1255_v49, %v425_v51 }
 0x2ba   :  { %v431_v56 = vpop.xlane.xlu0 %430 }
 0x2bb   :  { %974 = vpow2.f32 %v484_v53  ;;  %v471_v58 = vsub.f32 %v1259_v50, %v431_v56  ;;  %v486_v52 = vmul.f32 1.442695, %v469_v54 }
 0x2bc   :  { %v440_v59 = vpop.xlane.xlu1 %439 }
 0x2bd   :  { %v490_v60 = vmul.f32 1.442695, %v471_v58  ;;  %v474_v55 = vsub.f32 %v1267_v57, %v440_v59 }
 0x2be   :  { %v443_v61 = vpop.xlane.xlu0 %442 }
 0x2bf   :  { %976 = vpow2.f32 %v490_v60  ;;  %v496_v36 = vmul.f32 1.442695, %v474_v55  ;;  %v475_v62 = vsub.f32 %v1281_v5, %v443_v61 }
 0x2c0   :  { %978 = vpow2.f32 %v486_v52  ;;  %v434_v41 = vpop.xlane.xlu1 %433 }
 0x2c1   :  { %980 = vpow2.f32 %v496_v36  ;;  %v498_v63 = vmul.f32 1.442695, %v475_v62  ;;  %v472_v49 = vsub.f32 %v1286_v6, %v434_v41 }
 0x2c2   :  { %v437_v1 = vpop.xlane.xlu0 %436 }
 0x2c3   :  { %v492_v3 = vmul.f32 1.442695, %v472_v49  ;;  %v473_v50 = vsub.f32 %v1292_v11, %v437_v1  ;;  %982 = vpow2.f32 %v498_v63 }
 0x2c4   :  { %v1363_v4 = vpop.eup %972  ;;  %v452_v8 = vpop.xlane.xlu1 %451 }
 0x2c5   :  { %984 = vpow2.f32 %v492_v3  ;;  %v494_v57 = vmul.f32 1.442695, %v473_v50  ;;  %v478_v10 = vsub.f32 %v1296_v12, %v452_v8  ;;  %v522_v5 = vsel %vm419_vm2, %v1363_v4, 0.0 }
 0x2c6   :  { %v455_v13 = vpop.xlane.xlu0 %454  ;;  %523 = vadd.xlane.f32.xlu1 %v522_v5 }
 0x2c7   :  { %986 = vpow2.f32 %v494_v57  ;;  %v504_v15 = vmul.f32 1.442695, %v478_v10  ;;  %v479_v12 = vsub.f32 %v1306_v21, %v455_v13 }
 0x2c8   :  { %v1368_v14 = vpop.eup %974  ;;  %v446_v6 = vpop.xlane.xlu1 %445 }
 0x2c9   :  { %v476_v11 = vsub.f32 %v1311_v24, %v446_v6  ;;  %v516_v16 = vsel %vm419_vm2, %v1368_v14, 0.0  ;;  %988 = vpow2.f32 %v504_v15  ;;  %v506_v32 = vmul.f32 1.442695, %v479_v12 }
 0x2ca   :  { %v449_v17 = vpop.xlane.xlu0 %448  ;;  %517 = vadd.xlane.f32.xlu1 %v516_v16 }
 0x2cb   :  { %v500_v19 = vmul.f32 1.442695, %v476_v11 }
 0x2cc   :  { %v1373_v18 = vpop.eup %976  ;;  %v464_v20 = vpop.xlane.xlu1 %463 }
 0x2cd   :  { %v1376_v22 = vpop.eup %978  ;;  %v482_v23 = vsub.f32 %v1323_v30, %v464_v20  ;;  %v525_v25 = vsel %vm419_vm2, %v1373_v18, 0.0  ;;  %990 = vpow2.f32 %v500_v19  ;;  %v477_v30 = vsub.f32 %v1318_v28, %v449_v17 }
 0x2ce   :  { %v1381_v24 = vpop.eup %980  ;;  %v467_v26 = vpop.xlane.xlu0 %466  ;;  %526 = vadd.xlane.f32.xlu0 %v525_v25  ;;  %v519_v37 = vsel %vm419_vm2, %v1376_v22, 0.0 }
 0x2cf   :  { %v512_v31 = vmul.f32 1.442695, %v482_v23  ;;  %v483_v27 = vsub.f32 %v1334_v38, %v467_v26  ;;  %v534_v21 = vsel %vm419_vm2, %v1381_v24, 0.0  ;;  %v502_v46 = vmul.f32 1.442695, %v477_v30 }
 0x2d0   :  { %535 = vadd.xlane.f32.xlu1 %v534_v21  ;;  %v458_v34 = vpop.xlane.xlu1 %457  ;;  %v1386_v35 = vpop.eup %982 }
 0x2d1   :  { %992 = vpow2.f32 %v512_v31  ;;  %v480_v33 = vsub.f32 %v1339_v39, %v458_v34  ;;  %v514_v43 = vmul.f32 1.442695, %v483_v27  ;;  %v537_v39 = vsel %vm419_vm2, %v1386_v35, 0.0 }
 0x2d2   :  { %v1392_v40 = vpop.eup %984  ;;  %520 = vadd.xlane.f32.xlu0 %v519_v37  ;;  %v461_v38 = vpop.xlane.xlu0 %460  ;;  %994 = vpow2.f32 %v506_v32 }
 0x2d3   :  { %v508_v44 = vmul.f32 1.442695, %v480_v33  ;;  %v528_v45 = vsel %vm419_vm2, %v1392_v40, 0.0  ;;  %v481_v28 = vsub.f32 %v1345_v42, %v461_v38 }
 0x2d4   :  { %529 = vadd.xlane.f32.xlu1 %v528_v45  ;;  %v1399_v29 = vpop.eup %986  ;;  %v605_v48 = vpop.permute.xlu1 %604 }
 0x2d5   :  { %996 = vpow2.f32 %v508_v44  ;;  %v510_v51 = vmul.f32 1.442695, %v481_v28  ;;  %v531_v53 = vsel %vm419_vm2, %v1399_v29, 0.0 }
 0x2d6   :  { %538 = vadd.xlane.f32.xlu0 %v537_v39  ;;  %v607_v47 = vpop.permute.xlu0 %606  ;;  %998 = vpow2.f32 %v514_v43  ;;  %v1403_v54 = vpop.eup %988 }
 0x2d7   :  { %934 = vmatprep.subr.bf16.mxu1 %v607_v47  ;;  %1000 = vpow2.f32 %v502_v46  ;;  %v546_v56 = vsel %vm419_vm2, %v1403_v54, 0.0 }
 0x2d8   :  { %935 = vmatpush3.bf16.msra.mxu1 %v607_v47  ;;  %1002 = vpow2.f32 %v510_v51 }
 0x2d9   :  { %936 = vmatprep.subr.bf16.mxu1 %v605_v48 }
 0x2da   :  { %532 = vadd.xlane.f32.xlu0 %v531_v53  ;;  %v1405_v42 = vpop.eup %990 }
 0x2db   :  { %v540_v60 = vsel %vm419_vm2, %v1405_v42, 0.0 }
 0x2dc   :  { %937 = vmatpush3.bf16.msra.mxu1 %v605_v48 }
 0x2de   :  { %v1409_v58 = vpop.eup %992  ;;  %547 = vadd.xlane.f32.xlu0 %v546_v56 }
 0x2df   :  { %v558_v52 = vsel %vm419_vm2, %v1409_v58, 0.0  ;;  %v1413_v59 = vpop.eup %994 }
 0x2e0   :  { %559 = vadd.xlane.f32.xlu1 %v558_v52  ;;  %v549_v62 = vsel %vm419_vm2, %v1413_v59, 0.0 }
 0x2e2   :  { %v1417_v55 = vpop.eup %996  ;;  %541 = vadd.xlane.f32.xlu0 %v540_v60 }
 0x2e3   :  { %v552_v61 = vsel %vm419_vm2, %v1417_v55, 0.0  ;;  %v1421_v36 = vpop.eup %998 }
 0x2e4   :  { %553 = vadd.xlane.f32.xlu1 %v552_v61  ;;  %v1425_v41 = vpop.eup %1000  ;;  %v561_v63 = vsel %vm419_vm2, %v1421_v36, 0.0 }
 0x2e5   :  { %v543_v49 = vsel %vm419_vm2, %v1425_v41, 0.0  ;;  %v1431_v1 = vpop.eup %1002 }
 0x2e6   :  { %550 = vadd.xlane.f32.xlu0 %v549_v62  ;;  %v555_v3 = vsel %vm419_vm2, %v1431_v1, 0.0 }
 0x2e8   :  { %562 = vadd.xlane.f32.xlu1 %v561_v63 }
 0x2ea   :  { %544 = vadd.xlane.f32.xlu0 %v543_v49 }
 0x2ee   :  { %556 = vadd.xlane.f32.xlu0 %v555_v3 }
 0x2f9   :  { %697 = vrot.lane.b32.xlu1 %v1175_v9, %s1037_s0 }
 0x2fd   :  { %695 = vrot.lane.b32.xlu1 %v1162_v0, %s1037_s0 }
 0x301   :  { %693 = vrot.lane.b32.xlu1 %v1164_v2, %s1037_s0 }
 0x304   :  { %699 = vrot.lane.b32.xlu0 %v1173_v7, %s1037_s0 }
 0x34f   :  { %v524_v50 = vpop.xlane.xlu1 %523 }
 0x353   :  { %v518_v8 = vpop.xlane.xlu1 %517 }
 0x357   :  { %v527_v57 = vpop.xlane.xlu0 %526 }
 0x358   :  { %1004 = vrcp.f32 %v527_v57 }
 0x359   :  { %v536_v10 = vpop.xlane.xlu1 %535  ;;  %1006 = vrcp.f32 %v518_v8 }
 0x35a   :  { %1008 = vrcp.f32 %v524_v50 }
 0x35b   :  { %v521_v5 = vpop.xlane.xlu0 %520 }
 0x35c   :  { %1010 = vrcp.f32 %v521_v5 }
 0x35d   :  { %v530_v13 = vpop.xlane.xlu1 %529 }
 0x35f   :  { %v539_v9 = vpop.xlane.xlu0 %538 }
 0x360   :  { %1012 = vrcp.f32 %v539_v9 }
 0x361   :  { %1014 = vrcp.f32 %v530_v13 }
 0x362   :  { %1016 = vrcp.f32 %v536_v10 }
 0x363   :  { %v533_v0 = vpop.xlane.xlu0 %532 }
 0x364   :  { %1018 = vrcp.f32 %v533_v0 }
 0x365   :  { %v1005_v2 = vpop.eup %1004 }
 0x366   :  { %v1007_v6 = vpop.eup %1006  ;;  %v583_v16 = vmul.f32 %v1005_v2, %v1373_v18 }
 0x367   :  { %v548_v15 = vpop.xlane.xlu0 %547  ;;  %v1009_v7 = vpop.eup %1008  ;;  %v580_v12 = vmul.f32 %v1007_v6, %v1368_v14 }
 0x368   :  { %v582_v20 = vmul.f32 %v1009_v7, %v1363_v4 }
 0x369   :  { %v1011_v11 = vpop.eup %1010  ;;  %v560_v17 = vpop.xlane.xlu1 %559 }
 0x36a   :  { %v581_v19 = vmul.f32 %v1011_v11, %v1376_v22  ;;  %v597_v26 = vpack.c.bf16 %v583_v16, %v582_v20 }
 0x36b   :  { %v542_v23 = vpop.xlane.xlu0 %541 }
 0x36c   :  { %v596_v25 = vpack.c.bf16 %v581_v19, %v580_v12  ;;  %1020 = vrcp.f32 %v542_v23 }
 0x36d   :  { %v554_v31 = vpop.xlane.xlu1 %553  ;;  %v1013_v27 = vpop.eup %1012 }
 0x36e   :  { %938 = vmatprep.mubr.msk.bf16.mxu1 %vm419_vm2, %v596_v25  ;;  %v1015_v21 = vpop.eup %1014  ;;  %v587_v30 = vmul.f32 %v1013_v27, %v1386_v35 }
 0x36f   :  { %939 = vmatmul.mubr.msk.bf16.vlgmr.msra.gmra.mxu1 %vm419_vm2, %v597_v26  ;;  %v551_v32 = vpop.xlane.xlu0 %550  ;;  %v1017_v34 = vpop.eup %1016  ;;  %v584_v14 = vmul.f32 %v1015_v21, %v1392_v40 }
 0x370   :  { %v586_v37 = vmul.f32 %v1017_v34, %v1381_v24 }
 0x371   :  { %v1019_v18 = vpop.eup %1018  ;;  %v563_v22 = vpop.xlane.xlu1 %562 }
 0x372   :  { %v585_v4 = vmul.f32 %v1019_v18, %v1399_v29  ;;  %v599_v43 = vpack.c.bf16 %v587_v30, %v586_v37 }
 0x373   :  { %v545_v33 = vpop.xlane.xlu0 %544 }
 0x374   :  { %1022 = vrcp.f32 %v545_v33  ;;  %v598_v38 = vpack.c.bf16 %v585_v4, %v584_v14 }
 0x375   :  { %1024 = vrcp.f32 %v551_v32  ;;  %v698_v35 = vpop.permute.xlu1 %697 }
 0x376   :  { %942 = vmatprep.mubr.msk.bf16.mxu1 %vm419_vm2, %v598_v38  ;;  %1026 = vrcp.f32 %v548_v15 }
 0x377   :  { %943 = vmatmul.mubr.msk.bf16.gmra.mxu1 %vm419_vm2, %v599_v43  ;;  %v557_v44 = vpop.xlane.xlu0 %556 }
 0x378   :  { %1028 = vrcp.f32 %v557_v44 }
 0x379   :  { %1030 = vrcp.f32 %v554_v31  ;;  %v1021_v45 = vpop.eup %1020  ;;  %v696_v24 = vpop.permute.xlu1 %695 }
 0x37a   :  { %1032 = vrcp.f32 %v563_v22  ;;  %v588_v28 = vmul.f32 %v1021_v45, %v1405_v42 }
 0x37b   :  { %v700_v40 = vpop.permute.xlu0 %699  ;;  %1034 = vrcp.f32 %v560_v17 }
 0x37c   :  { %946 = vmatprep.subr.bf16.mxu1 %v700_v40 }
 0x37d   :  { %947 = vmatpush3.bf16.msra.mxu1 %v700_v40  ;;  %v694_v53 = vpop.permute.xlu1 %693 }
 0x37e   :  { %948 = vmatprep.subr.bf16.mxu1 %v698_v35 }
 0x381   :  { %v1023_v46 = vpop.eup %1022  ;;  %949 = vmatpush3.bf16.msra.mxu1 %v698_v35 }
 0x382   :  { %950 = vmatprep.subr.bf16.mxu1 %v696_v24  ;;  %v589_v39 = vmul.f32 %v1023_v46, %v1425_v41  ;;  %v1025_v29 = vpop.eup %1024 }
 0x383   :  { %v1027_v47 = vpop.eup %1026  ;;  %v591_v52 = vmul.f32 %v1025_v29, %v1413_v59 }
 0x384   :  { %v600_v48 = vpack.c.bf16 %v589_v39, %v588_v28  ;;  %v590_v61 = vmul.f32 %v1027_v47, %v1403_v54 }
 0x385   :  { %v1029_v51 = vpop.eup %1028  ;;  %951 = vmatpush3.bf16.msra.mxu1 %v696_v24 }
 0x386   :  { %v1031_v56 = vpop.eup %1030  ;;  %952 = vmatprep.subr.bf16.mxu1 %v694_v53  ;;  %954 = vmatprep.mubr.msk.bf16.mxu1 %vm419_vm2, %v600_v48  ;;  %v593_v60 = vmul.f32 %v1029_v51, %v1431_v1  ;;  %v601_v62 = vpack.c.bf16 %v591_v52, %v590_v61 }
 0x387   :  { %v592_v42 = vmul.f32 %v1031_v56, %v1417_v55  ;;  %v1033_v41 = vpop.eup %1032 }
 0x388   :  { %v1035_v49 = vpop.eup %1034  ;;  %v595_v59 = vmul.f32 %v1033_v41, %v1421_v36 }
 0x389   :  { %953 = vmatpush3.bf16.msra.mxu1 %v694_v53  ;;  %v602_v63 = vpack.c.bf16 %v593_v60, %v592_v42  ;;  %v594_v3 = vmul.f32 %v1035_v49, %v1409_v58 }
 0x38b   :  { %v603_v50 = vpack.c.bf16 %v595_v59, %v594_v3 }
 0x38c   :  { %955 = vmatmul.mubr.msk.bf16.vlgmr.msra.gmra.mxu1 %vm419_vm2, %v601_v62 }
 0x38d   :  { %958 = vmatprep.mubr.msk.bf16.mxu1 %vm419_vm2, %v602_v63 }
 0x394   :  { %959 = vmatmul.mubr.msk.bf16.gmra.mxu1 %vm419_vm2, %v603_v50 }
 0x42f   :  { %v940_v1 = vpop.f32.mrf.mxu1 }
 0x430   :  { %784 = vst.msk [vmem:[%s1533_s2 + $0x10] sm:$0xff] %vm177_vm0, %v940_v1 }
 0x431   :  { %v662_v54 = vpop.f32.mrf.mxu1 }
 0x432   :  { %782 = vst.msk [vmem:[%s1533_s2] sm:$0xff] %vm177_vm0, %v662_v54 }
 0x433   :  { %v941_v55 = vpop.f32.mrf.mxu1 }
 0x434   :  { %785 = vst.msk [vmem:[%s1533_s2 + $0x18] sm:$0xff] %vm177_vm0, %v941_v55 }
 0x435   :  { %v665_v58 = vpop.f32.mrf.mxu1 }
 0x436   :  { %783 = vst.msk [vmem:[%s1533_s2 + $0x8] sm:$0xff] %vm177_vm0, %v665_v58 }
 0x437   :  { %v944_v36 = vpop.f32.mrf.mxu1 }
 0x438   :  { %788 = vst.msk [vmem:[%s1533_s2 + $0x30] sm:$0xff] %vm177_vm0, %v944_v36 }
 0x439   :  { %v678_v8 = vpop.f32.mrf.mxu1 }
 0x43a   :  { %786 = vst.msk [vmem:[%s1533_s2 + $0x20] sm:$0xff] %vm177_vm0, %v678_v8 }
 0x43b   :  { %v945_v57 = vpop.f32.mrf.mxu1 }
 0x43c   :  { %789 = vst.msk [vmem:[%s1533_s2 + $0x38] sm:$0xff] %vm177_vm0, %v945_v57 }
 0x43d   :  { %v681_v10 = vpop.f32.mrf.mxu1 }
 0x43e   :  { %787 = vst.msk [vmem:[%s1533_s2 + $0x28] sm:$0xff] %vm177_vm0, %v681_v10 }
 0x44c   :  { %v956_v5 = vpop.f32.mrf.mxu1 }
 0x44d   :  { %792 = vst.msk [vmem:[%s1533_s2 + $0x50] sm:$0xff] %vm177_vm0, %v956_v5 }
 0x44e   :  { %v751_v13 = vpop.f32.mrf.mxu1 }
 0x44f   :  { %790 = vst.msk [vmem:[%s1533_s2 + $0x40] sm:$0xff] %vm177_vm0, %v751_v13 }
 0x450   :  { %v957_v9 = vpop.f32.mrf.mxu1 }
 0x451   :  { %793 = vst.msk [vmem:[%s1533_s2 + $0x58] sm:$0xff] %vm177_vm0, %v957_v9 }
 0x452   :  { %v754_v0 = vpop.f32.mrf.mxu1 }
 0x453   :  { %791 = vst.msk [vmem:[%s1533_s2 + $0x48] sm:$0xff] %vm177_vm0, %v754_v0 }
 0x454   :  { %v960_v2 = vpop.f32.mrf.mxu1 }
 0x455   :  { %796 = vst.msk [vmem:[%s1533_s2 + $0x70] sm:$0xff] %vm177_vm0, %v960_v2 }
 0x456   :  { %v767_v6 = vpop.f32.mrf.mxu1 }
 0x457   :  { %794 = vst.msk [vmem:[%s1533_s2 + $0x60] sm:$0xff] %vm177_vm0, %v767_v6 }
 0x458   :  { %v961_v15 = vpop.f32.mrf.mxu1 }
 0x459   :  { %797 = vst.msk [vmem:[%s1533_s2 + $0x78] sm:$0xff] %vm177_vm0, %v961_v15 }
 0x45a   :  { %v770_v7 = vpop.f32.mrf.mxu1 }
 0x45b   :  { %795 = vst.msk [vmem:[%s1533_s2 + $0x68] sm:$0xff] %vm177_vm0, %v770_v7 }

</bundles_post_ra>
